<compile_context>
chip_gen: v6e
topology: v6e:2x2x1
jax: 0.10.0
libtpu: 0.0.40
codegen_flags: <defaults>
</compile_context>

<pallas_src>
import functools

import jax
import jax.numpy as jnp
from jax.experimental import pallas as pl
from jax.experimental.pallas import tpu as pltpu

LANES = 128
NCORES = 2  # leading "parallel" grid axis; uses both TCs on v7x, harmless on 1-TC chips


def _round_up(x, m):
    return ((x + m - 1) // m) * m


def _dice_kernel(lg_ref, tg_ref, out_ref, *, tm, per_core, rows, total, needs_mask):
    c = pl.program_id(0)   # parallel (core) axis
    i = pl.program_id(1)   # arbitrary (reduction) axis

    @pl.when(i == 0)
    def _init():
        out_ref[...] = jnp.zeros_like(out_ref)

    lg = lg_ref[...].astype(jnp.float32)
    tg = tg_ref[...].astype(jnp.float32)

    # single-transcendental sigmoid (one EUP push per element)
    p = 0.5 * (jnp.tanh(0.5 * lg) + 1.0)

    if needs_mask:
        # Mask out rows/lanes past the valid element count (handles the ragged
        # tail and the fully-out-of-range duplicate block on the second core).
        row0 = (c * per_core + i) * tm
        row_ids = jax.lax.broadcasted_iota(jnp.int32, (tm, LANES), 0) + row0
        if total % LANES == 0:
            mask = row_ids < rows
        else:
            lane_ids = jax.lax.broadcasted_iota(jnp.int32, (tm, LANES), 1)
            mask = (row_ids * LANES + lane_ids) < total
        p = jnp.where(mask, p, 0.0)
        tg = jnp.where(mask, tg, 0.0)

    # Per-step sublane partial reduction: (tm,128) -> (8,128) via VPU adds only.
    pt = jnp.sum((p * tg).reshape(tm // 8, 8, LANES), axis=0)   # intersection stream
    un = jnp.sum((p + tg).reshape(tm // 8, 8, LANES), axis=0)   # union stream (p + t)

    out_ref[0, 0] += pt
    out_ref[0, 1] += un


def dice_loss(logits, targets, *, eps=1e-9):
    """Pallas TPU implementation of the PyTorch DiceLoss.forward."""
    assert logits.shape == targets.shape
    total = int(logits.size)
    rows = pl.cdiv(total, LANES)

    lg = logits.reshape(-1)
    tg = targets.reshape(-1)
    pad = rows * LANES - total
    if pad:
        # TODO(synk): sizes not divisible by 128 need one flat append of <128
        # zeros (a copy); 128-divisible sizes take the copy-free path.
        lg = jnp.pad(lg, (0, pad))
        tg = jnp.pad(tg, (0, pad))
    lg2 = lg.reshape(rows, LANES)
    tg2 = tg.reshape(rows, LANES)

    # Big tiles amortize the ~0.35us/grid-step overhead; multiple of 32 keeps
    # the block legal for f32 / bf16 / int8 inputs.
    tm = min(1024, _round_up(rows, 32))
    nblk = pl.cdiv(rows, tm)
    per_core = pl.cdiv(nblk, NCORES)
    covered = NCORES * per_core * tm * LANES
    needs_mask = covered != total

    in_map = lambda c, i: (jnp.minimum(c * per_core + i, nblk - 1), 0)

    kernel = functools.partial(
        _dice_kernel, tm=tm, per_core=per_core, rows=rows, total=total,
        needs_mask=needs_mask)

    partials = pl.pallas_call(
        kernel,
        out_shape=jax.ShapeDtypeStruct((NCORES, 2, 8, LANES), jnp.float32),
        grid=(NCORES, per_core),
        in_specs=[
            pl.BlockSpec((tm, LANES), in_map),
            pl.BlockSpec((tm, LANES), in_map),
        ],
        out_specs=pl.BlockSpec((1, 2, 8, LANES), lambda c, i: (c, 0, 0, 0)),
        compiler_params=pltpu.CompilerParams(
            dimension_semantics=("parallel", "arbitrary")),
    )(lg2, tg2)

    pt_sum = jnp.sum(partials[:, 0])
    union = jnp.sum(partials[:, 1])
    # eps added to numerator only — matches the PyTorch module exactly.
    return 1.0 - (2.0 * pt_sum + eps) / union


def _ref_dice_loss(logits, targets, eps=1e-9):
    p = jax.nn.sigmoid(logits).reshape(logits.shape[0], -1)
    t = targets.reshape(targets.shape[0], -1).astype(p.dtype)
    intersection = 2.0 * jnp.sum(p * t)
    union = jnp.sum(p) + jnp.sum(t)
    return 1.0 - (intersection + eps) / union


if __name__ == "__main__":
    key = jax.random.PRNGKey(0)
    loss_fn = jax.jit(dice_loss)

    # Case 1: batch=2, channels=4, spatial 16x16 (total divisible by 128).
    k_l, k_t, k_l2, k_t2 = jax.random.split(key, 4)
    logits = jax.random.normal(k_l, (2, 4, 16, 16), jnp.float32)
    targets = (jax.random.uniform(k_t, (2, 4, 16, 16)) > 0.5).astype(jnp.float32)
    loss = jax.block_until_ready(loss_fn(logits, targets))
    ref = _ref_dice_loss(logits, targets)
    assert jnp.isfinite(loss)
    assert jnp.allclose(loss, ref, rtol=1e-5, atol=1e-5), (float(loss), float(ref))

    # Case 2: ragged size (exercises the in-kernel tail mask path).
    logits2 = jax.random.normal(k_l2, (2, 3, 15, 17), jnp.float32)
    targets2 = (jax.random.uniform(k_t2, (2, 3, 15, 17)) > 0.5).astype(jnp.float32)
    loss2 = jax.block_until_ready(loss_fn(logits2, targets2))
    ref2 = _ref_dice_loss(logits2, targets2)
    assert jnp.isfinite(loss2)
    assert jnp.allclose(loss2, ref2, rtol=1e-5, atol=1e-5), (float(loss2), float(ref2))

    print("KERNEL_OK")
</pallas_src>

<mosaic_0001>
module attributes {stable_mosaic.version = 11 : i64} {
  func.func @_dice_kernel(%arg0: i32, %arg1: i32, %arg2: memref<32x128xf32, #tpu.memory_space<vmem>>, %arg3: memref<32x128xf32, #tpu.memory_space<vmem>>, %arg4: memref<1x2x8x128xf32, #tpu.memory_space<vmem>>) attributes {dimension_semantics = [#tpu.dimension_semantics<parallel>, #tpu.dimension_semantics<arbitrary>], iteration_bounds = array<i64: 2, 1>, scalar_prefetch = 0 : i64, scratch_operands = 0 : i64, tpu.core_type = #tpu.core_type<tc>, window_params = [{transform_indices = @transform_0, window_bounds = array<i64: 32, 128>}, {transform_indices = @transform_1, window_bounds = array<i64: 32, 128>}, {transform_indices = @transform_2, window_bounds = array<i64: 1, 2, 8, 128>}]} {
    %c0_i32 = arith.constant 0 : i32
    %0 = arith.cmpi eq, %arg1, %c0_i32 : i32
    %1 = arith.extui %0 : i1 to i32
    %c0_i32_0 = arith.constant 0 : i32
    %2 = arith.cmpi ne, %1, %c0_i32_0 : i32
    scf.if %2 {
      %cst_25 = arith.constant 0.000000e+00 : f32
      %42 = vector.broadcast %cst_25 : f32 to vector<1x2x8x128xf32>
      %c0_26 = arith.constant 0 : index
      %c0_27 = arith.constant 0 : index
      %c0_28 = arith.constant 0 : index
      %c0_29 = arith.constant 0 : index
      %43 = vector.load %arg4[%c0_26, %c0_27, %c0_28, %c0_29] : memref<1x2x8x128xf32, #tpu.memory_space<vmem>>, vector<1x2x8x128xf32>
      tpu.vector_store %arg4[%c0_26, %c0_27, %c0_28, %c0_29], %42 {strides = array<i32>} : memref<1x2x8x128xf32, #tpu.memory_space<vmem>>, vector<1x2x8x128xf32>,
    } else {
    }
    %c0 = arith.constant 0 : index
    %c0_1 = arith.constant 0 : index
    %3 = vector.load %arg2[%c0, %c0_1] : memref<32x128xf32, #tpu.memory_space<vmem>>, vector<32x128xf32>
    %c0_2 = arith.constant 0 : index
    %c0_3 = arith.constant 0 : index
    %4 = vector.load %arg3[%c0_2, %c0_3] : memref<32x128xf32, #tpu.memory_space<vmem>>, vector<32x128xf32>
    %cst = arith.constant 5.000000e-01 : f32
    %5 = vector.broadcast %cst : f32 to vector<32x128xf32>
    %6 = arith.mulf %5, %3 : vector<32x128xf32>
    %7 = math.tanh %6 : vector<32x128xf32>
    %cst_4 = arith.constant 1.000000e+00 : f32
    %8 = vector.broadcast %cst_4 : f32 to vector<32x128xf32>
    %9 = arith.addf %7, %8 : vector<32x128xf32>
    %cst_5 = arith.constant 5.000000e-01 : f32
    %10 = vector.broadcast %cst_5 : f32 to vector<32x128xf32>
    %11 = arith.mulf %10, %9 : vector<32x128xf32>
    %c1_i32 = arith.constant 1 : i32
    %12 = arith.muli %arg0, %c1_i32 : i32
    %13 = arith.addi %12, %arg1 : i32
    %c32_i32 = arith.constant 32 : i32
    %14 = arith.muli %13, %c32_i32 : i32
    %15 = tpu.iota {dimensions = array<i32: 0>} : vector<32x128xi32>
    %16 = vector.broadcast %14 : i32 to vector<32x128xi32>
    %17 = arith.addi %15, %16 : vector<32x128xi32>
    %c16_i32 = arith.constant 16 : i32
    %18 = vector.broadcast %c16_i32 : i32 to vector<32x128xi32>
    %19 = arith.cmpi slt, %17, %18 : vector<32x128xi32>
    %cst_6 = arith.constant 0.000000e+00 : f32
    %20 = vector.broadcast %cst_6 : f32 to vector<32x128xf32>
    %21 = arith.select %19, %11, %20 : vector<32x128xi1>, vector<32x128xf32>
    %cst_7 = arith.constant 0.000000e+00 : f32
    %22 = vector.broadcast %cst_7 : f32 to vector<32x128xf32>
    %23 = arith.select %19, %4, %22 : vector<32x128xi1>, vector<32x128xf32>
    %24 = arith.mulf %21, %23 : vector<32x128xf32>
    %25 = vector.shape_cast %24 : vector<32x128xf32> to vector<4x8x128xf32>
    %cst_8 = arith.constant dense<0.000000e+00> : vector<8x128xf32>
    %26 = vector.multi_reduction <add>, %25, %cst_8 [0] : vector<4x8x128xf32> to vector<8x128xf32>
    %27 = arith.addf %21, %23 : vector<32x128xf32>
    %28 = vector.shape_cast %27 : vector<32x128xf32> to vector<4x8x128xf32>
    %cst_9 = arith.constant dense<0.000000e+00> : vector<8x128xf32>
    %29 = vector.multi_reduction <add>, %28, %cst_9 [0] : vector<4x8x128xf32> to vector<8x128xf32>
    %c0_10 = arith.constant 0 : index
    %c0_11 = arith.constant 0 : index
    %c0_12 = arith.constant 0 : index
    %c0_13 = arith.constant 0 : index
    %30 = vector.load %arg4[%c0_10, %c0_11, %c0_12, %c0_13] : memref<1x2x8x128xf32, #tpu.memory_space<vmem>>, vector<1x1x8x128xf32>
    %31 = vector.shape_cast %30 : vector<1x1x8x128xf32> to vector<8x128xf32>
    %32 = arith.addf %31, %26 : vector<8x128xf32>
    %c0_14 = arith.constant 0 : index
    %c0_15 = arith.constant 0 : index
    %c0_16 = arith.constant 0 : index
    %c0_17 = arith.constant 0 : index
    %33 = vector.load %arg4[%c0_14, %c0_15, %c0_16, %c0_17] : memref<1x2x8x128xf32, #tpu.memory_space<vmem>>, vector<1x1x8x128xf32>
    %34 = vector.shape_cast %33 : vector<1x1x8x128xf32> to vector<8x128xf32>
    %35 = vector.shape_cast %32 : vector<8x128xf32> to vector<1x1x8x128xf32>
    tpu.vector_store %arg4[%c0_14, %c0_15, %c0_16, %c0_17], %35 {strides = array<i32>} : memref<1x2x8x128xf32, #tpu.memory_space<vmem>>, vector<1x1x8x128xf32>,
    %c0_18 = arith.constant 0 : index
    %c1 = arith.constant 1 : index
    %c0_19 = arith.constant 0 : index
    %c0_20 = arith.constant 0 : index
    %36 = vector.load %arg4[%c0_18, %c1, %c0_19, %c0_20] : memref<1x2x8x128xf32, #tpu.memory_space<vmem>>, vector<1x1x8x128xf32>
    %37 = vector.shape_cast %36 : vector<1x1x8x128xf32> to vector<8x128xf32>
    %38 = arith.addf %37, %29 : vector<8x128xf32>
    %c0_21 = arith.constant 0 : index
    %c1_22 = arith.constant 1 : index
    %c0_23 = arith.constant 0 : index
    %c0_24 = arith.constant 0 : index
    %39 = vector.load %arg4[%c0_21, %c1_22, %c0_23, %c0_24] : memref<1x2x8x128xf32, #tpu.memory_space<vmem>>, vector<1x1x8x128xf32>
    %40 = vector.shape_cast %39 : vector<1x1x8x128xf32> to vector<8x128xf32>
    %41 = vector.shape_cast %38 : vector<8x128xf32> to vector<1x1x8x128xf32>
    tpu.vector_store %arg4[%c0_21, %c1_22, %c0_23, %c0_24], %41 {strides = array<i32>} : memref<1x2x8x128xf32, #tpu.memory_space<vmem>>, vector<1x1x8x128xf32>,
    return
  }
  func.func @transform_0(%arg0: i32, %arg1: i32) -> (i32, i32) {
    %c1_i32 = arith.constant 1 : i32
    %0 = arith.muli %arg0, %c1_i32 : i32
    %1 = arith.addi %0, %arg1 : i32
    %c0_i32 = arith.constant 0 : i32
    %2 = arith.minsi %1, %c0_i32 : i32
    %c0_i32_0 = arith.constant 0 : i32
    %c0_i32_1 = arith.constant 0 : i32
    return %2, %c0_i32_0 : i32, i32
  }
  func.func @transform_1(%arg0: i32, %arg1: i32) -> (i32, i32) {
    %c1_i32 = arith.constant 1 : i32
    %0 = arith.muli %arg0, %c1_i32 : i32
    %1 = arith.addi %0, %arg1 : i32
    %c0_i32 = arith.constant 0 : i32
    %2 = arith.minsi %1, %c0_i32 : i32
    %c0_i32_0 = arith.constant 0 : i32
    %c0_i32_1 = arith.constant 0 : i32
    return %2, %c0_i32_0 : i32, i32
  }
  func.func @transform_2(%arg0: i32, %arg1: i32) -> (i32, i32, i32, i32) {
    %c0_i32 = arith.constant 0 : i32
    %c0_i32_0 = arith.constant 0 : i32
    %c0_i32_1 = arith.constant 0 : i32
    %c0_i32_2 = arith.constant 0 : i32
    return %arg0, %c0_i32, %c0_i32_0, %c0_i32_1 : i32, i32, i32, i32
  }
}

</mosaic_0001>

<bundles_post_ra>
// kernel: dice_loss.1
= control target key start
LH: loop header
LB: loop body
LE: loop exit
PB: predicated region body
PF: predicated region fallthrough
CT: control target
= control target key end

     0   :  { %s481_s9 = smov 0   ;;  %s483_s10 = smov 0   ;;  %s534_s0 = inlined_call_operand.vmem [shape: f32[16,128], index: 0, kind: input, shape index: {}]   ;;  %s535_s1 = inlined_call_operand.vmem [shape: f32[16,128], index: 1, kind: input, shape index: {}]   ;;  %s536_s2 = inlined_call_operand.vmem [shape: f32[2,2,8,128], index: 2, kind: output, shape index: {}]  }
   0x1   :  { %s485_s11 = smov 0  }
   0x2 LB: > { %s24_s12 = sadd.s32 1, %s460_s10  ;;  %p396_p0 = scmp.ge.s32.totalorder %s464_s11, 1  ;;  %s464_s11 = sphi %s485_s11, %s12_s11   ;;  %s460_s10 = sphi %s483_s10, %s538_s10   ;;  %s456_s9 = sphi %s481_s9, %s537_s9  }
   0x3   : > { %p26_p1 = scmp.ge.s32.totalorder %s24_s12, 2  ;;  %p168_p2 = scmp.lt.s32.totalorder %s464_s11, 3 }
   0x5   : > { %s540_s12 = smov (%p26_p1, %s24_s12), 0  ;;  %p169_p3 = pnand %p396_p0, %p168_p2 }
   0x6   : > { %p206_p4 = scmp.lt.s32.totalorder (!%p169_p3), %s456_s9, 0  ;;  %s403_s19 = sshll.u32 (!%p169_p3), %s456_s9, 5 }
   0x7   : > { %172 = sbr.rel (%p169_p3) target bundleno = 52 (0x34), region = 28  ;;  %p237_p6 = scmp.lt.s32.totalorder (!%p169_p3), %s456_s9, 1 }
   0xc   : > { %s207_s13 = scalar_select %p206_p4, %s456_s9, 0  ;;  %v274_v7 = vlaneseq  ;;  %v279_v11 = vstv %s403_s19 }
   0xd   : > { %s544_s9 = smov (!%p237_p6, %s456_s9), 1 }
   0xe   : > { %s397_s14 = sshll.u32 %s207_s13, 2  ;;  %v275_v9 = vshrl.u32 %v274_v7, 7  ;;  %s408_s23 = sshll.u32 %s544_s9, 4 }
   0xf   : > { %p211_p5 = scmp.lt.s32.totalorder %s397_s14, 1  ;;  %s241_s26 = scalar_lea.vmem %s536_s2, %s408_s23 }
  0x10   : > { %v276_v10 = vadd.s32 8, %v275_v9  ;;  %v277_v12 = vadd.s32 16, %v275_v9  ;;  %v278_v13 = vadd.s32 24, %v275_v9  ;;  %v280_v14 = vadd.s32 %v279_v11, %v275_v9 }
  0x11   : > { %s542_s14 = smov (!%p211_p5, %s397_s14), 1 }
  0x12   : > { %s398_s15 = sshll.u32 %s542_s14, 3  ;;  %v281_v15 = vadd.s32 %v279_v11, %v276_v10  ;;  %v282_v16 = vadd.s32 %v279_v11, %v277_v12  ;;  %v283_v17 = vadd.s32 %v279_v11, %v278_v13  ;;  %vm284_vm0 = vcmp.lt.s32.totalorder %v280_v14, 16 }
  0x13   : > { %s214_s18 = scalar_lea.vmem %s534_s0, %s398_s15  ;;  %s230_s22 = scalar_lea.vmem %s535_s1, %s398_s15 }
  0x14   : > { %v248_v0 = vld [vmem:[%s214_s18] sm:$0xff]  ;;  %v249_v1 = vld [vmem:[%s214_s18 + $0x8] sm:$0xff]  ;;  %v250_v2 = vld [vmem:[%s214_s18 + $0x10] sm:$0xff]  ;;  %vm285_vm1 = vcmp.lt.s32.totalorder %v281_v15, 16  ;;  %vm286_vm2 = vcmp.lt.s32.totalorder %v282_v16, 16  ;;  %vm287_vm3 = vcmp.lt.s32.totalorder %v283_v17, 16 }
  0x15   : > { %v251_v3 = vld [vmem:[%s214_s18 + $0x18] sm:$0xff]  ;;  %v256_v4 = vmul.f32 0.5, %v248_v0  ;;  %v257_v5 = vmul.f32 0.5, %v249_v1  ;;  %v258_v6 = vmul.f32 0.5, %v250_v2  ;;  %v252_v19 = vld [vmem:[%s230_s22] sm:$0xff]  ;;  %v253_v21 = vld [vmem:[%s230_s22 + $0x8] sm:$0xff] }
  0x16   : > { %v259_v8 = vmul.f32 0.5, %v251_v3  ;;  %v254_v24 = vld [vmem:[%s230_s22 + $0x10] sm:$0xff]  ;;  %v255_v25 = vld [vmem:[%s230_s22 + $0x18] sm:$0xff]  ;;  %v292_v30 = vsel %vm284_vm0, %v252_v19, 0.0  ;;  %v293_v33 = vsel %vm285_vm1, %v253_v21, 0.0 }
  0x17   : > { %434 = vtanh.f32 %v256_v4  ;;  %v294_v36 = vsel %vm286_vm2, %v254_v24, 0.0  ;;  %v295_v37 = vsel %vm287_vm3, %v255_v25, 0.0 }
  0x18   : > { %436 = vtanh.f32 %v257_v5 }
  0x19   : > { %438 = vtanh.f32 %v258_v6 }
  0x1a   : > { %440 = vtanh.f32 %v259_v8 }
  0x24   : > { %v435_v18 = vpop.eup %434 }
  0x25   : > { %v437_v20 = vpop.eup %436  ;;  %v264_v22 = vadd.f32 1.0, %v435_v18 }
  0x26   : > { %v439_v23 = vpop.eup %438  ;;  %v265_v26 = vadd.f32 1.0, %v437_v20 }
  0x27   : > { %v441_v27 = vpop.eup %440  ;;  %v266_v28 = vadd.f32 1.0, %v439_v23  ;;  %v268_v29 = vmul.f32 0.5, %v264_v22 }
  0x28   : > { %v267_v31 = vadd.f32 1.0, %v441_v27  ;;  %v269_v32 = vmul.f32 0.5, %v265_v26 }
  0x29   : > { %v270_v34 = vmul.f32 0.5, %v266_v28  ;;  %v288_v35 = vsel %vm284_vm0, %v268_v29, 0.0 }
  0x2a   : > { %v271_v38 = vmul.f32 0.5, %v267_v31  ;;  %v289_v39 = vsel %vm285_vm1, %v269_v32, 0.0  ;;  %v296_v40 = vmul.f32 %v292_v30, %v288_v35  ;;  %v303_v41 = vadd.f32 %v292_v30, %v288_v35 }
  0x2b   : > { %v290_v42 = vsel %vm286_vm2, %v270_v34, 0.0  ;;  %v297_v43 = vmul.f32 %v293_v33, %v289_v39  ;;  %v304_v44 = vadd.f32 %v293_v33, %v289_v39 }
  0x2c   : > { %v291_v45 = vsel %vm287_vm3, %v271_v38, 0.0  ;;  %v298_v46 = vmul.f32 %v294_v36, %v290_v42  ;;  %v305_v47 = vadd.f32 %v294_v36, %v290_v42 }
  0x2d   : > { %v299_v48 = vmul.f32 %v295_v37, %v291_v45  ;;  %v300_v49 = vadd.f32 %v297_v43, %v296_v40  ;;  %v306_v50 = vadd.f32 %v295_v37, %v291_v45  ;;  %v307_v51 = vadd.f32 %v304_v44, %v303_v41 }
  0x2f   : > { %v301_v52 = vadd.f32 %v300_v49, %v298_v46  ;;  %v308_v53 = vadd.f32 %v307_v51, %v305_v47 }
  0x31   : > { %v302_v54 = vadd.f32 %v301_v52, %v299_v48  ;;  %v309_v55 = vadd.f32 %v308_v53, %v306_v50 }
  0x33   : > { %312 = vst [vmem:[%s241_s26] sm:$0xff] %v302_v54  ;;  %405 = vst [vmem:[%s241_s26 + $0x8] sm:$0xff] %v309_v55 }
  0x34 PF: > { %s12_s11 = sadd.s32 1, %s464_s11   ;;  %s537_s9 = smov %s460_s10 }
  0x35   : > { %p9_p7 = scmp.ge.s32.totalorder %s12_s11, 4   ;;  %s538_s10 = smov %s540_s12 }
  0x37   :  { %11 = sbr.rel (!%p9_p7) target bundleno = 2 (0x2), region = 66 }

</bundles_post_ra>
